<compile_context>
chip_gen: v7x
topology: tpu7x:2x2x1
jax: 0.10.0
libtpu: 0.0.40
codegen_flags: <defaults>
</compile_context>

<pallas_src>
import jax
import jax.numpy as jnp
from jax.experimental import pallas as pl
from jax.experimental.pallas import tpu as pltpu

_LANE = 128
# MXU operand dtype (accumulation is always f32 via preferred_element_type).
_MXU_DTYPE = jnp.bfloat16


def _round_up(x, m):
    return ((x + m - 1) // m) * m


def _make_critic_kernel(n_parts):
    def kernel(*refs):
        part_refs = refs[:n_parts]
        w1_refs = refs[n_parts:2 * n_parts]
        b1_ref, w2_ref, b2_ref, w3_ref, b3_ref, o_ref = refs[2 * n_parts:]

        # fc1 (+ReLU): torch.cat fused away -> sum of per-part MXU matmuls with
        # f32 accumulation; bias added once at the end so MXU results can chain
        # before the (1,E)->(tm,E) VPU broadcast-add.
        acc = None
        for p_ref, w_ref in zip(part_refs, w1_refs):
            c = jnp.dot(p_ref[...].astype(_MXU_DTYPE), w_ref[...],
                        preferred_element_type=jnp.float32)
            acc = c if acc is None else acc + c
        h1 = jnp.maximum(acc + b1_ref[...], 0.0)

        # fc2 (+ReLU)
        h2 = jnp.dot(h1.astype(_MXU_DTYPE), w2_ref[...],
                     preferred_element_type=jnp.float32) + b2_ref[...]
        h2 = jnp.maximum(h2, 0.0)

        # out: Linear(hidden, 1), produced directly as a lane-dense (1, tm) row by
        # contracting the hidden dims of w3 (1, H) and h2 (tm, H) -- the same NT
        # dot_general pattern flash attention uses for q @ k^T.  This avoids the
        # (tm, 1) column layout and its masked single-lane stores.
        row = jax.lax.dot_general(
            w3_ref[...], h2.astype(_MXU_DTYPE),
            dimension_numbers=(((1,), (1,)), ((), ())),
            preferred_element_type=jnp.float32)
        o_ref[...] = (row + b3_ref[...]).astype(o_ref.dtype)

    return kernel


def _prepare_params(params, part_dims):
    """Pad hidden dims to 128 lanes, split W1 per input part, cast MXU weights."""
    w1, b1, w2, b2, w3, b3 = params
    e, h = w1.shape[1], w2.shape[1]
    e_pad = _round_up(e, _LANE)
    h_pad = _round_up(h, _LANE)

    # Zero-padded hidden columns/rows are numerically inert (relu(0)=0, 0-weights).
    w1p = jnp.pad(w1, ((0, 0), (0, e_pad - e)))
    b1p = jnp.pad(b1, ((0, 0), (0, e_pad - e)))
    w2p = jnp.pad(w2, ((0, e_pad - e), (0, h_pad - h)))
    b2p = jnp.pad(b2, ((0, 0), (0, h_pad - h)))
    w3_row = jnp.pad(w3, ((0, h_pad - h), (0, 0))).T          # (1, h_pad)

    # Static per-part slices of W1 (free) -> torch.cat fused into the kernel.
    w1_parts, off = [], 0
    for d in part_dims:
        w1_parts.append(w1p[off:off + d].astype(_MXU_DTYPE))
        off += d
    return (tuple(w1_parts), b1p, w2p.astype(_MXU_DTYPE), b2p,
            w3_row.astype(_MXU_DTYPE), b3)


def _single_tensorcore_chip():
    """True for chips known to expose a single TensorCore per device (v5e/v6e)."""
    try:
        kind = jax.devices()[0].device_kind.lower()
    except Exception:
        return False
    return any(t in kind for t in ("v5e", "v5 lite", "v5lite",
                                   "v6e", "v6 lite", "v6lite"))


def _choose_tile(b, tm_max, d_in, in_itemsize, e_pad, h_pad):
    # VMEM guard: double-buffered input block + f32/bf16 intermediates per row;
    # stay well under the 32 MiB scoped default (v7x physical VMEM is 64 MiB).
    bytes_per_row = 2 * d_in * in_itemsize + 8 * (e_pad + h_pad)
    tm_fit = max(16, int((20 * 1024 * 1024) // bytes_per_row) // 16 * 16)
    tm_max = max(16, min(tm_max, tm_fit))

    # On multi-TC chips make sure the "parallel" grid axis has >= 2 steps so both
    # cores get work; skipped on single-TC v5e/v6e (would only add one grid step).
    min_tiles = 2 if (b >= 256 and not _single_tensorcore_chip()) else 1

    n_tiles = max(pl.cdiv(b, tm_max), min_tiles)
    if n_tiles == 1:
        return b  # single exact tile: no padding, no masked tail at all
    # Balance the tail: smallest 16-aligned tile covering b in n_tiles steps
    # (<= 15 wasted rows per tile), the tail handled by Pallas' masked edge block.
    return _round_up(pl.cdiv(b, n_tiles), 16)


def critic_forward(parts, params, tm_max=2048):
    """parts: tuple/list of (B, f_i) arrays (the tensors torch.cat()'ed in forward)."""
    parts = tuple(parts)
    n_parts = len(parts)
    part_dims = tuple(int(p.shape[-1]) for p in parts)
    b = int(parts[0].shape[0])
    d_in = sum(part_dims)

    w1_parts, b1p, w2p, b2p, w3_row, b3 = _prepare_params(params, part_dims)
    e_pad = b1p.shape[1]
    h_pad = b2p.shape[1]

    tm = _choose_tile(b, tm_max, d_in, parts[0].dtype.itemsize, e_pad, h_pad)
    num_tiles = pl.cdiv(b, tm)
    grid = (num_tiles,)

    # No wrapper-side batch pad (that was an extra HBM round trip on the dominant
    # input stream); rows are independent and tail rows are sliced off below.
    x_specs = [pl.BlockSpec((tm, d), lambda i: (i, 0)) for d in part_dims]

    # Weights/biases pinned across the grid (constant block index).
    def resident(a):
        return pl.BlockSpec(a.shape, lambda i: (0, 0))

    w_specs = ([resident(w) for w in w1_parts]
               + [resident(b1p), resident(w2p), resident(b2p),
                  resident(w3_row), resident(b3)])

    # Lane-dense output: one (1, tm) row per tile; squeezed leading tile dim.
    out_spec = pl.BlockSpec((None, 1, tm), lambda i: (i, 0, 0))

    flops = 2 * b * (d_in * e_pad + e_pad * h_pad + h_pad)
    bytes_accessed = (sum(p.size * p.dtype.itemsize for p in parts)
                      + sum(w.size * w.dtype.itemsize
                            for w in (*w1_parts, b1p, w2p, b2p, w3_row, b3))
                      + num_tiles * tm * 4)

    out = pl.pallas_call(
        _make_critic_kernel(n_parts),
        out_shape=jax.ShapeDtypeStruct((num_tiles, 1, tm), jnp.float32),
        grid=grid,
        in_specs=x_specs + w_specs,
        out_specs=out_spec,
        compiler_params=pltpu.CompilerParams(dimension_semantics=("parallel",)),
        cost_estimate=pl.CostEstimate(flops=flops, transcendentals=0,
                                      bytes_accessed=bytes_accessed),
    )(*parts, *w1_parts, b1p, w2p, b2p, w3_row, b3)

    return out.reshape(num_tiles * tm)[:b].reshape(b, 1)


def init_params(key, embedding_dim, hidden_dim, act_size, state_ratio):
    """Deterministic synthetic init mirroring nn.Linear shapes (stored (in, out))."""
    d_in = act_size + state_ratio * embedding_dim
    ks = jax.random.split(key, 6)

    def lin(kw, kb, fan_in, fan_out):
        bound = 1.0 / jnp.sqrt(fan_in)
        w = jax.random.uniform(kw, (fan_in, fan_out), jnp.float32, -bound, bound)
        b = jax.random.uniform(kb, (1, fan_out), jnp.float32, -bound, bound)
        return w, b

    w1, b1 = lin(ks[0], ks[1], d_in, embedding_dim)
    w2, b2 = lin(ks[2], ks[3], embedding_dim, hidden_dim)
    w3, b3 = lin(ks[4], ks[5], hidden_dim, 1)
    return (w1, b1, w2, b2, w3, b3)


def _reference(parts, params):
    """Pure-JAX reference mirroring the kernel numerics (bf16 MXU, f32 accumulate)."""
    s = jnp.concatenate(parts, axis=-1)
    w1, b1, w2, b2, w3, b3 = params
    h1 = jnp.maximum(jnp.dot(s.astype(_MXU_DTYPE), w1.astype(_MXU_DTYPE),
                             preferred_element_type=jnp.float32) + b1, 0.0)
    h2 = jnp.maximum(jnp.dot(h1.astype(_MXU_DTYPE), w2.astype(_MXU_DTYPE),
                             preferred_element_type=jnp.float32) + b2, 0.0)
    return jnp.dot(h2.astype(_MXU_DTYPE), w3.astype(_MXU_DTYPE),
                   preferred_element_type=jnp.float32) + b3


if __name__ == "__main__":
    embedding_dim = 32
    hidden_dim = 32
    act_size = 8
    state_ratio = 2
    batch = 8

    key = jax.random.PRNGKey(0)
    k_state, k_act, k_params = jax.random.split(key, 3)

    # forward(x) receives a list of tensors to concatenate: (state, action)
    state = jax.random.normal(k_state, (batch, state_ratio * embedding_dim), jnp.float32)
    action = jax.random.normal(k_act, (batch, act_size), jnp.float32)
    params = init_params(k_params, embedding_dim, hidden_dim, act_size, state_ratio)

    out = critic_forward((state, action), params)
    out = jax.block_until_ready(out)
    ref = _reference((state, action), params)

    assert out.shape == (batch, 1)
    assert jnp.allclose(out, ref, atol=2e-4, rtol=2e-4), \
        float(jnp.max(jnp.abs(out - ref)))

    # Second check: non-divisible batch with a forced small tile so the masked
    # edge-block (no-pad) tail path is exercised end to end.
    b2 = 20
    k_s2, k_a2 = jax.random.split(jax.random.PRNGKey(1), 2)
    state2 = jax.random.normal(k_s2, (b2, state_ratio * embedding_dim), jnp.float32)
    action2 = jax.random.normal(k_a2, (b2, act_size), jnp.float32)
    out2 = jax.block_until_ready(critic_forward((state2, action2), params, tm_max=16))
    ref2 = _reference((state2, action2), params)
    assert out2.shape == (b2, 1)
    assert jnp.allclose(out2, ref2, atol=2e-4, rtol=2e-4), \
        float(jnp.max(jnp.abs(out2 - ref2)))

    print("KERNEL_OK")
</pallas_src>

<mosaic_0001>
module attributes {stable_mosaic.version = 11 : i64} {
  func.func @kernel(%arg0: i32, %arg1: memref<8x64xf32, #tpu.memory_space<vmem>>, %arg2: memref<8x8xf32, #tpu.memory_space<vmem>>, %arg3: memref<64x128xbf16, #tpu.memory_space<vmem>>, %arg4: memref<8x128xbf16, #tpu.memory_space<vmem>>, %arg5: memref<1x128xf32, #tpu.memory_space<vmem>>, %arg6: memref<128x128xbf16, #tpu.memory_space<vmem>>, %arg7: memref<1x128xf32, #tpu.memory_space<vmem>>, %arg8: memref<1x128xbf16, #tpu.memory_space<vmem>>, %arg9: memref<1x1xf32, #tpu.memory_space<vmem>>, %arg10: memref<1x1x8xf32, #tpu.memory_space<vmem>>) attributes {dimension_semantics = [#tpu.dimension_semantics<parallel>], iteration_bounds = array<i64: 1>, scalar_prefetch = 0 : i64, scratch_operands = 0 : i64, tpu.core_type = #tpu.core_type<tc>, window_params = [{transform_indices = @transform_0, window_bounds = array<i64: 8, 64>}, {transform_indices = @transform_1, window_bounds = array<i64: 8, 8>}, {pipeline_mode = #tpu.pipeline_mode<synchronous>, transform_indices = @transform_2, window_bounds = array<i64: 64, 128>}, {pipeline_mode = #tpu.pipeline_mode<synchronous>, transform_indices = @transform_3, window_bounds = array<i64: 8, 128>}, {pipeline_mode = #tpu.pipeline_mode<synchronous>, transform_indices = @transform_4, window_bounds = array<i64: 1, 128>}, {pipeline_mode = #tpu.pipeline_mode<synchronous>, transform_indices = @transform_5, window_bounds = array<i64: 128, 128>}, {pipeline_mode = #tpu.pipeline_mode<synchronous>, transform_indices = @transform_6, window_bounds = array<i64: 1, 128>}, {pipeline_mode = #tpu.pipeline_mode<synchronous>, transform_indices = @transform_7, window_bounds = array<i64: 1, 128>}, {pipeline_mode = #tpu.pipeline_mode<synchronous>, transform_indices = @transform_8, window_bounds = array<i64: 1, 1>}, {transform_indices = @transform_9, window_bounds = array<i64: 1, 1, 8>}]} {
    %c0 = arith.constant 0 : index
    %c0_0 = arith.constant 0 : index
    %0 = vector.load %arg1[%c0, %c0_0] : memref<8x64xf32, #tpu.memory_space<vmem>>, vector<8x64xf32>
    %1 = arith.truncf %0 : vector<8x64xf32> to vector<8x64xbf16>
    %c0_1 = arith.constant 0 : index
    %c0_2 = arith.constant 0 : index
    %2 = vector.load %arg3[%c0_1, %c0_2] : memref<64x128xbf16, #tpu.memory_space<vmem>>, vector<64x128xbf16>
    %cst = arith.constant dense<0.000000e+00> : vector<8x128xf32>
    %3 = tpu.matmul %1, %2, %cst {dimension_numbers = #tpu.dot_dimension_numbers<[1], [0], [0], [1], [0, 0, 1, 1], [], []>} : vector<8x64xbf16>, vector<64x128xbf16>, vector<8x128xf32> -> vector<8x128xf32>
    %c0_3 = arith.constant 0 : index
    %c0_4 = arith.constant 0 : index
    %4 = vector.load %arg2[%c0_3, %c0_4] : memref<8x8xf32, #tpu.memory_space<vmem>>, vector<8x8xf32>
    %5 = arith.truncf %4 : vector<8x8xf32> to vector<8x8xbf16>
    %c0_5 = arith.constant 0 : index
    %c0_6 = arith.constant 0 : index
    %6 = vector.load %arg4[%c0_5, %c0_6] : memref<8x128xbf16, #tpu.memory_space<vmem>>, vector<8x128xbf16>
    %cst_7 = arith.constant dense<0.000000e+00> : vector<8x128xf32>
    %7 = tpu.matmul %5, %6, %cst_7 {dimension_numbers = #tpu.dot_dimension_numbers<[1], [0], [0], [1], [0, 0, 1, 1], [], []>} : vector<8x8xbf16>, vector<8x128xbf16>, vector<8x128xf32> -> vector<8x128xf32>
    %8 = arith.addf %3, %7 : vector<8x128xf32>
    %c0_8 = arith.constant 0 : index
    %c0_9 = arith.constant 0 : index
    %9 = vector.load %arg5[%c0_8, %c0_9] : memref<1x128xf32, #tpu.memory_space<vmem>>, vector<1x128xf32>
    %10 = vector.broadcast %9 : vector<1x128xf32> to vector<8x128xf32>
    %11 = arith.addf %8, %10 : vector<8x128xf32>
    %cst_10 = arith.constant 0.000000e+00 : f32
    %12 = vector.broadcast %cst_10 : f32 to vector<8x128xf32>
    %13 = arith.maximumf %11, %12 : vector<8x128xf32>
    %14 = arith.truncf %13 : vector<8x128xf32> to vector<8x128xbf16>
    %c0_11 = arith.constant 0 : index
    %c0_12 = arith.constant 0 : index
    %15 = vector.load %arg6[%c0_11, %c0_12] : memref<128x128xbf16, #tpu.memory_space<vmem>>, vector<128x128xbf16>
    %cst_13 = arith.constant dense<0.000000e+00> : vector<8x128xf32>
    %16 = tpu.matmul %14, %15, %cst_13 {dimension_numbers = #tpu.dot_dimension_numbers<[1], [0], [0], [1], [0, 0, 1, 1], [], []>} : vector<8x128xbf16>, vector<128x128xbf16>, vector<8x128xf32> -> vector<8x128xf32>
    %c0_14 = arith.constant 0 : index
    %c0_15 = arith.constant 0 : index
    %17 = vector.load %arg7[%c0_14, %c0_15] : memref<1x128xf32, #tpu.memory_space<vmem>>, vector<1x128xf32>
    %18 = vector.broadcast %17 : vector<1x128xf32> to vector<8x128xf32>
    %19 = arith.addf %16, %18 : vector<8x128xf32>
    %cst_16 = arith.constant 0.000000e+00 : f32
    %20 = vector.broadcast %cst_16 : f32 to vector<8x128xf32>
    %21 = arith.maximumf %19, %20 : vector<8x128xf32>
    %c0_17 = arith.constant 0 : index
    %c0_18 = arith.constant 0 : index
    %22 = vector.load %arg8[%c0_17, %c0_18] : memref<1x128xbf16, #tpu.memory_space<vmem>>, vector<1x128xbf16>
    %23 = arith.truncf %21 : vector<8x128xf32> to vector<8x128xbf16>
    %cst_19 = arith.constant dense<0.000000e+00> : vector<1x8xf32>
    %24 = tpu.matmul %22, %23, %cst_19 {dimension_numbers = #tpu.dot_dimension_numbers<[1], [1], [0], [0], [0, 0, 1, 0], [], []>} : vector<1x128xbf16>, vector<8x128xbf16>, vector<1x8xf32> -> vector<1x8xf32>
    %c0_20 = arith.constant 0 : index
    %c0_21 = arith.constant 0 : index
    %25 = vector.load %arg9[%c0_20, %c0_21] : memref<1x1xf32, #tpu.memory_space<vmem>>, vector<1x1xf32>
    %26 = vector.broadcast %25 : vector<1x1xf32> to vector<1x8xf32>
    %27 = arith.addf %24, %26 : vector<1x8xf32>
    %c0_22 = arith.constant 0 : index
    %c0_23 = arith.constant 0 : index
    %c0_24 = arith.constant 0 : index
    %28 = vector.load %arg10[%c0_22, %c0_23, %c0_24] : memref<1x1x8xf32, #tpu.memory_space<vmem>>, vector<1x1x8xf32>
    %29 = vector.shape_cast %28 : vector<1x1x8xf32> to vector<1x8xf32>
    %30 = vector.shape_cast %27 : vector<1x8xf32> to vector<1x1x8xf32>
    tpu.vector_store %arg10[%c0_22, %c0_23, %c0_24], %30 {strides = array<i32>} : memref<1x1x8xf32, #tpu.memory_space<vmem>>, vector<1x1x8xf32>,
    return
  }
  func.func @transform_0(%arg0: i32) -> (i32, i32) {
    %c0_i32 = arith.constant 0 : i32
    %c0_i32_0 = arith.constant 0 : i32
    return %arg0, %c0_i32 : i32, i32
  }
  func.func @transform_1(%arg0: i32) -> (i32, i32) {
    %c0_i32 = arith.constant 0 : i32
    %c0_i32_0 = arith.constant 0 : i32
    return %arg0, %c0_i32 : i32, i32
  }
  func.func @transform_2(%arg0: i32) -> (i32, i32) {
    %c0_i32 = arith.constant 0 : i32
    %c0_i32_0 = arith.constant 0 : i32
    %c0_i32_1 = arith.constant 0 : i32
    return %c0_i32, %c0_i32_0 : i32, i32
  }
  func.func @transform_3(%arg0: i32) -> (i32, i32) {
    %c0_i32 = arith.constant 0 : i32
    %c0_i32_0 = arith.constant 0 : i32
    %c0_i32_1 = arith.constant 0 : i32
    return %c0_i32, %c0_i32_0 : i32, i32
  }
  func.func @transform_4(%arg0: i32) -> (i32, i32) {
    %c0_i32 = arith.constant 0 : i32
    %c0_i32_0 = arith.constant 0 : i32
    %c0_i32_1 = arith.constant 0 : i32
    return %c0_i32, %c0_i32_0 : i32, i32
  }
  func.func @transform_5(%arg0: i32) -> (i32, i32) {
    %c0_i32 = arith.constant 0 : i32
    %c0_i32_0 = arith.constant 0 : i32
    %c0_i32_1 = arith.constant 0 : i32
    return %c0_i32, %c0_i32_0 : i32, i32
  }
  func.func @transform_6(%arg0: i32) -> (i32, i32) {
    %c0_i32 = arith.constant 0 : i32
    %c0_i32_0 = arith.constant 0 : i32
    %c0_i32_1 = arith.constant 0 : i32
    return %c0_i32, %c0_i32_0 : i32, i32
  }
  func.func @transform_7(%arg0: i32) -> (i32, i32) {
    %c0_i32 = arith.constant 0 : i32
    %c0_i32_0 = arith.constant 0 : i32
    %c0_i32_1 = arith.constant 0 : i32
    return %c0_i32, %c0_i32_0 : i32, i32
  }
  func.func @transform_8(%arg0: i32) -> (i32, i32) {
    %c0_i32 = arith.constant 0 : i32
    %c0_i32_0 = arith.constant 0 : i32
    %c0_i32_1 = arith.constant 0 : i32
    return %c0_i32, %c0_i32_0 : i32, i32
  }
  func.func @transform_9(%arg0: i32) -> (i32, i32, i32) {
    %c0_i32 = arith.constant 0 : i32
    %c0_i32_0 = arith.constant 0 : i32
    %c0_i32_1 = arith.constant 0 : i32
    return %arg0, %c0_i32, %c0_i32_0 : i32, i32, i32
  }
}

</mosaic_0001>

<bundles_post_ra>
// kernel: tpu_custom_call.1
= control target key start
LH: loop header
LB: loop body
LE: loop exit
PB: predicated region body
PF: predicated region fallthrough
CT: control target
= control target key end

     0   :  { %s767_s0 = inlined_call_operand.hbm [shape: f32[8,64], index: 0, kind: input, shape index: {}]   ;;  %s768_s1 = inlined_call_operand.hbm [shape: f32[8,8], index: 1, kind: input, shape index: {}]   ;;  %s769_s2 = inlined_call_operand.hbm [shape: bf16[64,128], index: 2, kind: input, shape index: {}]   ;;  %s770_s3 = inlined_call_operand.vmem [shape: bf16[8,128], index: 3, kind: input, shape index: {}]   ;;  %s771_s4 = inlined_call_operand.vmem [shape: f32[1,128], index: 4, kind: input, shape index: {}]   ;;  %s772_s5 = inlined_call_operand.hbm [shape: bf16[128,128], index: 5, kind: input, shape index: {}]   ;;  %s773_s6 = inlined_call_operand.vmem [shape: f32[1,128], index: 6, kind: input, shape index: {}]   ;;  %s774_s7 = inlined_call_operand.vmem [shape: bf16[1,128], index: 7, kind: input, shape index: {}]   ;;  %s775_s8 = inlined_call_operand.<no memory space> [shape: f32[1,1], index: 8, kind: input, shape index: {}]   ;;  %s776_s9 = inlined_call_operand.hbm [shape: f32[1,1,8], index: 9, kind: output, shape index: {}]  }
   0x1   :  { %v14_v0 = vstv %s775_s8 }
   0x2   :  { %15 = vst [vmem:[#allocation2] sm:$0x1] %v14_v0 }
   0x3   :  { %16 = vsyncpa [#allocation4], 0 }
   0x4   :  { %17 = vsyncpa [#allocation7], 0 }
   0x5   :  { %18 = vsyncpa [#allocation10], 0 }
   0x6   :  { %19 = vsyncpa [#allocation5], 0  ;;  %s628_s11 = smov [#allocation6]   ;;  %s629_s13 = smov [#allocation3]  }
   0x7   :  { %s36_s12 = sshll.u32 %s628_s11, 4  ;;  %s26_s14 = sshll.u32 %s629_s13, 4  ;;  %s37_s12 = int_to_ptr.vmem [resolvable:$true] %s36_s12  ;;  %s27_s14 = int_to_ptr.vmem [resolvable:$true] %s26_s14 }
   0x8   :  { %s510_s17 = scalar_lea.hbm %s768_s1, 128 }
   0x9   :  { %p511_p0 = scmp.ne.s32.totalorder %s768_s1, %s510_s17  ;;  %p514_p1 = scmp.lt.u32.totalorder %s510_s17, %s768_s1 }
   0xb   :  { %p516_p2 = pnand %p514_p1, %p511_p0 }
   0xd   :  { %519 = shalt.err (!%p516_p2)
}
   0xe   :  { %s520_s21 = scalar_lea.vmem %s37_s12, 128  ;;  %p525_p4 = scmp.lt.s32.totalorder %s37_s12, %s37_s12 }
   0xf   :  { %p521_p3 = scmp.ne.s32.totalorder %s37_s12, %s520_s21  ;;  %p526_p5 = scmp.lt.s32.totalorder %s520_s21, %s520_s21 }
  0x11   :  { %p527_p6 = por %p526_p5, %p525_p4 }
  0x13   :  { %p528_p7 = pnand %p527_p6, %p521_p3 }
  0x15   :  { %531 = shalt.err (!%p528_p7)
}
  0x16   :  { %39 = dma.hbm_to_vmem [thread:$0]  %s768_s1, 128, %s37_s12, [#allocation7]  }
  0x17   :  { %s532_s26 = scalar_lea.hbm %s767_s0, 128 }
  0x18   :  { %p533_p8 = scmp.ne.s32.totalorder %s767_s0, %s532_s26  ;;  %p536_p9 = scmp.lt.u32.totalorder %s532_s26, %s767_s0 }
  0x1a   :  { %p538_p10 = pnand %p536_p9, %p533_p8 }
  0x1c   :  { %541 = shalt.err (!%p538_p10)
}
  0x1d   :  { %s542_s10 = scalar_lea.vmem %s27_s14, 128  ;;  %p547_p12 = scmp.lt.s32.totalorder %s27_s14, %s27_s14 }
  0x1e   :  { %p543_p11 = scmp.ne.s32.totalorder %s27_s14, %s542_s10  ;;  %p548_p13 = scmp.lt.s32.totalorder %s542_s10, %s542_s10 }
  0x20   :  { %p549_p0 = por %p548_p13, %p547_p12 }
  0x22   :  { %p550_p1 = pnand %p549_p0, %p543_p11 }
  0x24   :  { %553 = shalt.err (!%p550_p1)
}
  0x25   :  { %29 = dma.hbm_to_vmem [thread:$0]  %s767_s0, 128, %s27_s14, [#allocation4]  }
  0x26   :  { %s630_s12 = smov [#allocation8]   ;;  %s554_s17 = scalar_lea.hbm %s769_s2, 512 }
  0x27   :  { %s45_s13 = sshll.u32 %s630_s12, 4  ;;  %p555_p2 = scmp.ne.s32.totalorder %s769_s2, %s554_s17  ;;  %s46_s13 = int_to_ptr.vmem [resolvable:$true] %s45_s13 }
  0x28   :  { %p558_p3 = scmp.lt.u32.totalorder %s554_s17, %s769_s2 }
  0x2a   :  { %p560_p4 = pnand %p558_p3, %p555_p2 }
  0x2c   :  { %563 = shalt.err (!%p560_p4)
}
  0x2d   :  { %s564_s21 = scalar_lea.vmem %s46_s13, 512  ;;  %p569_p6 = scmp.lt.s32.totalorder %s46_s13, %s46_s13 }
  0x2e   :  { %p565_p5 = scmp.ne.s32.totalorder %s46_s13, %s564_s21  ;;  %p570_p7 = scmp.lt.s32.totalorder %s564_s21, %s564_s21 }
  0x30   :  { %p571_p8 = por %p570_p7, %p569_p6 }
  0x32   :  { %p572_p9 = pnand %p571_p8, %p565_p5 }
  0x34   :  { %575 = shalt.err (!%p572_p9)
}
  0x35   :  { %s631_s0 = smov 64   ;;  %s632_s14 = smov 4  }
  0x36   :  { %51 = dma.hbm_to_vmem [thread:$0]  %s769_s2, 512, %s46_s13, [#allocation7], %s631_s0, %s631_s0, %s632_s14  }
  0x37   :  { %s633_s24 = smov [#allocation9]   ;;  %s576_s28 = scalar_lea.hbm %s772_s5, 1024 }
  0x38   :  { %s61_s25 = sshll.u32 %s633_s24, 4  ;;  %p577_p10 = scmp.ne.s32.totalorder %s772_s5, %s576_s28  ;;  %s62_s25 = int_to_ptr.vmem [resolvable:$true] %s61_s25 }
  0x39   :  { %p580_p11 = scmp.lt.u32.totalorder %s576_s28, %s772_s5 }
  0x3b   :  { %p582_p12 = pnand %p580_p11, %p577_p10 }
  0x3d   :  { %585 = shalt.err (!%p582_p12)
}
  0x3e   :  { %s586_s11 = scalar_lea.vmem %s62_s25, 1024  ;;  %p591_p0 = scmp.lt.s32.totalorder %s62_s25, %s62_s25 }
  0x3f   :  { %p587_p13 = scmp.ne.s32.totalorder %s62_s25, %s586_s11  ;;  %p592_p1 = scmp.lt.s32.totalorder %s586_s11, %s586_s11 }
  0x41   :  { %p593_p2 = por %p592_p1, %p591_p0 }
  0x43   :  { %p594_p3 = pnand %p593_p2, %p587_p13 }
  0x45   :  { %597 = shalt.err (!%p594_p3)
}
  0x46   :  { %67 = dma.hbm_to_vmem [thread:$0]  %s772_s5, 1024, %s62_s25, [#allocation10], %s631_s0, %s631_s0, %s632_s14  }
  0x47   :  { %620 = dma.done.wait [#allocation4], 128  }
  0x48   :  { %621 = vsyncadd [#allocation4], 4294967168 }
  0x49   :  { %622 = dma.done.wait [#allocation7], 640  }
  0x4a   :  { %623 = vsyncadd [#allocation7], 4294966656 }
  0x4b   :  { %624 = dma.done.wait [#allocation10], 1024  }
  0x4c   :  { %625 = vsyncadd [#allocation10], 4294966272  ;;  %v634_v1 = vmov 0.0   ;;  %vm635_vm0 = vmmov 0   ;;  %vm104_vm1 = vcmask 1043456   ;;  %v97_v3 = vld [vmem:[#allocation6] sm:$0xff]  ;;  %v346_v44 = vlaneseq }
  0x4d   :  { %443 = vmatprep.subr.bf16.mxu1 %v634_v1  ;;  %445 = vmatprep.mubr.msk.bf16.mxu1 %vm635_vm0, %v634_v1  ;;  %v99_v2 = vld [vmem:[%s770_s3] sm:$0xf]  ;;  %v98_v5 = vpack.c.bf16 %v97_v3, %v97_v3  ;;  %vm100_vm2 = vcmask 64512   ;;  %v498_v6 = vld [vmem:[#allocation8] sm:$0xff]   ;;  %v501_v11 = vld [vmem:[#allocation8 + $0x18] sm:$0xff]   ;;  %vm172_vm3 = vcmask 523264  }
  0x4e   :  { %461 = vmatprep.subr.bf16.mxu0 %v634_v1  ;;  %477 = vmatprep.mubr.msk.bf16.mxu0 %vm635_vm0, %v634_v1  ;;  %v106_v4 = vsel %vm104_vm1, %v99_v2, 0  ;;  %v499_v7 = vld [vmem:[#allocation8 + $0x8] sm:$0xff]   ;;  %v502_v8 = vld [vmem:[#allocation9] sm:$0xff]   ;;  %v500_v10 = vld [vmem:[#allocation8 + $0x10] sm:$0xff]   ;;  %v636_v34 = vmov 0   ;;  %v347_v45 = vshrl.u32 %v346_v44, 7 }
  0x4f   :  { %444 = vmatpush3.bf16.msra.mxu1 %v106_v4  ;;  %v503_v9 = vld [vmem:[#allocation9 + $0x8] sm:$0xff]   ;;  %462 = vmatpush3.bf16.msra.mxu0 %v502_v8  ;;  %v87_v12 = vld [vmem:[#allocation3] sm:$0xff]  ;;  %v505_v15 = vld [vmem:[#allocation9 + $0x18] sm:$0xff]   ;;  %s637_s19 = smov [#allocation11]   ;;  %vm390_vm4 = vcmask 57344  }
  0x50   :  { %449 = vmatprep.subr.bf16.mxu1 %v634_v1  ;;  %463 = vmatprep.subr.bf16.mxu0 %v634_v1  ;;  %v88_v13 = vpack.c.bf16 %v87_v12, %v87_v12  ;;  %v504_v14 = vld [vmem:[#allocation9 + $0x10] sm:$0xff]   ;;  %v506_v16 = vld [vmem:[#allocation9 + $0x20] sm:$0xff]   ;;  %v507_v17 = vld [vmem:[#allocation9 + $0x28] sm:$0xff]   ;;  %v348_v46 = vsub.s32 0, %v347_v45 }
  0x51   :  { %v508_v18 = vld [vmem:[#allocation9 + $0x30] sm:$0xff]   ;;  %v509_v19 = vld [vmem:[#allocation9 + $0x38] sm:$0xff]   ;;  %v415_v25 = vld [vmem:[%s771_s4] ss:$0 sm:$0xff]  ;;  %497 = vset.pattern.permute.xlu0 %v636_v34 }
  0x52   :  { %446 = vmatmul.mubr.msk.bf16.vlgmr.msra.gmra.mrb[0].mxu1 %vm100_vm2, %v98_v5  ;;  %v340_v33 = vld [vmem:[#allocation2] sm:$0x1] }
  0x53   :  { %450 = vmatpush3.bf16.msra.mxu1 %v498_v6  ;;  %457 = vmatprep.mubr.msk.bf16.mxu1 %vm635_vm0, %v634_v1  ;;  %v416_v35 = vld [vmem:[%s773_s6] ss:$0 sm:$0xff]  ;;  %s398_s6 = sshll.u32 %s637_s19, 4  ;;  %s399_s6 = int_to_ptr.vmem [resolvable:$true] %s398_s6 }
  0x54   :  { %451 = vmatprep.subr.bf16.mxu1 %v634_v1  ;;  %464 = vmatpush3.bf16.msra.mxu0 %v503_v9  ;;  %v338_v43 = vld [vmem:[%s774_s7] sm:$0x1]  ;;  %s598_s8 = scalar_lea.vmem %s399_s6, 16  ;;  %s602_s20 = scalar_lea.vmem %s399_s6, 32 }
  0x55   :  { %465 = vmatprep.subr.bf16.mxu0 %v634_v1  ;;  %343 = vperm.xlu0 %497, %v340_v33   ;;  %p599_p4 = scmp.ne.s32.totalorder %s399_s6, %s598_s8  ;;  %p603_p5 = scmp.lt.s32.totalorder %s399_s6, %s399_s6 }
  0x56   :  { %p604_p6 = scmp.lt.s32.totalorder %s602_s20, %s598_s8 }
  0x57   :  { %452 = vmatpush3.bf16.msra.mxu1 %v499_v7 }
  0x58   :  { %453 = vmatprep.subr.bf16.mxu1 %v634_v1  ;;  %466 = vmatpush3.bf16.msra.mxu0 %v504_v14  ;;  %p605_p7 = por %p604_p6, %p603_p5 }
  0x59   :  { %467 = vmatprep.subr.bf16.mxu0 %v634_v1 }
  0x5a   :  { %p606_p8 = pnand %p605_p7, %p599_p4 }
  0x5b   :  { %454 = vmatpush3.bf16.msra.mxu1 %v500_v10 }
  0x5c   :  { %455 = vmatprep.subr.bf16.mxu1 %v634_v1  ;;  %468 = vmatpush3.bf16.msra.mxu0 %v505_v15 }
  0x5d   :  { %469 = vmatprep.subr.bf16.mxu0 %v634_v1 }
  0x5f   :  { %456 = vmatpush3.bf16.msra.mxu1 %v501_v11 }
  0x60   :  { %481 = vmatprep.subr.bf16.mxu1 %v634_v1  ;;  %470 = vmatpush3.bf16.msra.mxu0 %v506_v16 }
  0x61   :  { %471 = vmatprep.subr.bf16.mxu0 %v634_v1 }
  0x62   :  { %458 = vmatmul.mubr.msk.bf16.vlgmr.msra.gmra.mrb[4].mxu1 %vm172_vm3, %v88_v13 }
  0x63   :  { %483 = vmatprep.mubr.msk.bf16.mxu1 %vm635_vm0, %v634_v1 }
  0x64   :  { %472 = vmatpush3.bf16.msra.mxu0 %v507_v17 }
  0x65   :  { %473 = vmatprep.subr.bf16.mxu0 %v634_v1 }
  0x68   :  { %474 = vmatpush3.bf16.msra.mxu0 %v508_v18 }
  0x69   :  { %475 = vmatprep.subr.bf16.mxu0 %v634_v1 }
  0x6c   :  { %476 = vmatpush3.bf16.msra.mxu0 %v509_v19 }
  0xd4   :  { %v344_v47 = vpop.permute.xlu0 %343 }
  0xd5   :  { %v349_v48 = vrot.slane %v344_v47, %v348_v46 }
 0x125   :  { %v142_v20 = vpop.f32.mrb[0].mxu1 }
 0x126   :  { %v447_v21 = vpop.f32.mrb[1].mxu1 }
 0x127   :  { %v145_v22 = vpop.f32.mrb[2].mxu1 }
 0x128   :  { %v448_v23 = vpop.f32.mrb[3].mxu1 }
 0x135   :  { %v210_v24 = vpop.f32.mrb[4].mxu1 }
 0x136   :  { %v211_v26 = vadd.f32 %v210_v24, %v142_v20  ;;  %v459_v27 = vpop.f32.mrb[5].mxu1 }
 0x137   :  { %v213_v28 = vpop.f32.mrb[6].mxu1 }
 0x138   :  { %v223_v29 = vadd.f32 %v415_v25, %v211_v26  ;;  %v460_v30 = vpop.f32.mrb[7].mxu1 }
 0x13a   :  { %v224_v31 = vmax.f32 %v223_v29, 0.0 }
 0x13c   :  { %v225_v32 = vpack.c.bf16 %v224_v31, %v224_v31 }
 0x13e   :  { %478 = vmatmul.mubr.bf16.vlgmr.msra.gmra.mrb[0].mxu0 %v225_v32 }
 0x211   :  { %v331_v36 = vpop.f32.mrb[0].mxu0 }
 0x212   :  { %v332_v37 = vadd.f32 %v416_v35, %v331_v36  ;;  %v479_v38 = vpop.f32.mrb[1].mxu0 }
 0x213   :  { %v334_v39 = vpop.f32.mrb[2].mxu0 }
 0x214   :  { %v337_v40 = vmax.f32 %v332_v37, 0.0  ;;  %v480_v41 = vpop.f32.mrb[3].mxu0 }
 0x216   :  { %v339_v42 = vpack.c.bf16 %v337_v40, %v337_v40 }
 0x218   :  { %482 = vmatpush3.bf16.xpose.msra.mxu1 %v339_v42 }
 0x21f   :  { %484 = vmatmul.mubr.bf16.vlgmr.msra.gmra.mrb[8].mxu1 %v338_v43 }
 0x2f2   :  { %v384_v49 = vpop.f32.mrb[8].mxu1 }
 0x2f3   :  { %v385_v50 = vadd.f32 %v384_v49, %v349_v48  ;;  %v485_v51 = vpop.f32.mrb[9].mxu1 }
 0x2f4   :  { %v387_v52 = vpop.f32.mrb[10].mxu1 }
 0x2f5   :  { %v486_v53 = vpop.f32.mrb[11].mxu1  ;;  %391 = vst.msk [vmem:[#allocation11] sm:$0x1] %vm390_vm4, %v385_v50 }
 0x2f6   :  { %609 = shalt.err (!%p606_p8)
}
 0x2f7   :  { %s610_s0 = scalar_lea.hbm %s776_s9, 16 }
 0x2f8   :  { %p611_p9 = scmp.ne.s32.totalorder %s776_s9, %s610_s0  ;;  %p614_p10 = scmp.lt.u32.totalorder %s610_s0, %s776_s9 }
 0x2fa   :  { %p616_p11 = pnand %p614_p10, %p611_p9 }
 0x2fc   :  { %619 = shalt.err (!%p616_p11)
}
 0x2fd   :  { %401 = dma.vmem_to_hbm [thread:$0]  %s399_s6, 16, %s776_s9, [#allocation5]  }
 0x2fe   :  { %626 = dma.done.wait [#allocation5], 16  }
 0x2ff   :  { %627 = vsyncadd [#allocation5], 4294967280 }
 0x300   :  { %405 = vsyncpa [#allocation4], 1 }
 0x301   :  { %406 = vsyncpa [#allocation7], 1 }
 0x302   :  { %407 = vsyncpa [#allocation10], 1 }
 0x303   :  { %408 = vsyncpa [#allocation5], 1 }

</bundles_post_ra>
